<compile_context>
chip_gen: v5e
topology: v5e:2x2
jax: 0.10.0
libtpu: 0.0.40
codegen_flags: <defaults>
</compile_context>

<pallas_src>
import jax
import jax.numpy as jnp
from jax.experimental import pallas as pl
from jax.experimental.pallas import tpu as pltpu


def mlp_kernel(x_ref, w1_ref, b1_ref, w2_ref, b2_ref, o_ref):
    # x:  [bm, D_in] (bf16)   w1: [D_in, H] (bf16)   b1: [1, H]     (f32)
    # w2: [H, D_out] (bf16)   b2: [1, D_out] (f32)   o:  [bm, D_out]
    h = jnp.dot(x_ref[...], w1_ref[...], preferred_element_type=jnp.float32)
    h = jnp.maximum(h + b1_ref[...], 0.0)              # bias + ReLU in f32 (VPU)
    h = h.astype(w2_ref.dtype)                         # feed second MXU pass in bf16
    out = jnp.dot(h, w2_ref[...], preferred_element_type=jnp.float32)
    out = out + b2_ref[...]
    o_ref[...] = out.astype(o_ref.dtype)


def prepare_params(w1, b1, w2, b2, compute_dtype=jnp.bfloat16):
    """One-time parameter prep (hoisted out of the per-forward-call path).

    PyTorch-style weights [out_features, in_features] are transposed to
    [in, out] and cast to the MXU compute dtype; biases become 2-D f32 rows
    so they map cleanly onto (sublane, lane) tiles and the f32 epilogue.
    """
    w1_t = jnp.asarray(w1).T.astype(compute_dtype)          # [D_in, H]
    w2_t = jnp.asarray(w2).T.astype(compute_dtype)          # [H, D_out]
    b1_2d = jnp.asarray(b1).reshape(1, -1).astype(jnp.float32)   # [1, H]
    b2_2d = jnp.asarray(b2).reshape(1, -1).astype(jnp.float32)   # [1, D_out]
    return w1_t, b1_2d, w2_t, b2_2d


def mlp_forward(x, params, *, block_m=128):
    """x: [B, D_in] (any float dtype); params from prepare_params()."""
    w1_t, b1_2d, w2_t, b2_2d = params
    B, D_in = x.shape
    H = w1_t.shape[1]
    D_out = w2_t.shape[1]

    compute_dtype = w1_t.dtype
    x_c = x.astype(compute_dtype)

    # Batch tile: full extent when small (satisfies the (8,128) block rule),
    # otherwise 128-row tiles double-buffered across the grid.
    bm = B if B <= block_m else block_m
    grid_m = pl.cdiv(B, bm)

    itemsize = jnp.dtype(compute_dtype).itemsize
    cost = pl.CostEstimate(
        flops=2 * B * D_in * H + 2 * B * H * D_out,
        transcendentals=0,
        bytes_accessed=(B * D_in * itemsize
                        + D_in * H * itemsize
                        + H * D_out * itemsize
                        + (H + D_out) * 4
                        + B * D_out * jnp.dtype(x.dtype).itemsize),
    )

    return pl.pallas_call(
        mlp_kernel,
        out_shape=jax.ShapeDtypeStruct((B, D_out), x.dtype),
        grid_spec=pltpu.PrefetchScalarGridSpec(
            num_scalar_prefetch=0,
            grid=(grid_m,),
            in_specs=[
                pl.BlockSpec((bm, D_in), lambda i: (i, 0)),   # x tile per grid step
                pl.BlockSpec((D_in, H), lambda i: (0, 0)),    # weights stay resident
                pl.BlockSpec((1, H), lambda i: (0, 0)),
                pl.BlockSpec((H, D_out), lambda i: (0, 0)),
                pl.BlockSpec((1, D_out), lambda i: (0, 0)),
            ],
            out_specs=pl.BlockSpec((bm, D_out), lambda i: (i, 0)),
        ),
        compiler_params=pltpu.CompilerParams(
            dimension_semantics=("parallel",)),   # 2-TC sharding on v7x
        cost_estimate=cost,
    )(x_c, w1_t, b1_2d, w2_t, b2_2d)


def init_linear(key, out_features, in_features):
    """Deterministic PyTorch-style Linear init: U(-1/sqrt(fan_in), 1/sqrt(fan_in))."""
    kw, kb = jax.random.split(key)
    bound = 1.0 / (in_features ** 0.5)
    w = jax.random.uniform(kw, (out_features, in_features),
                           minval=-bound, maxval=bound, dtype=jnp.float32)
    b = jax.random.uniform(kb, (out_features,),
                           minval=-bound, maxval=bound, dtype=jnp.float32)
    return w, b


if __name__ == "__main__":
    # Small shapes consistent with the module's forward: x @ fc1 -> ReLU -> fc2.
    # NOTE: at these sizes (32/64/16 lanes) the MXU is heavily under-utilized;
    # the kernel structure is what matters (it scales to real shapes).
    batch, input_dim, hidden_dim, output_dim = 8, 32, 64, 16

    key = jax.random.PRNGKey(0)
    kx, k1, k2 = jax.random.split(key, 3)

    x = jax.random.normal(kx, (batch, input_dim), dtype=jnp.float32)
    w1, b1 = init_linear(k1, hidden_dim, input_dim)
    w2, b2 = init_linear(k2, output_dim, hidden_dim)

    params = prepare_params(w1, b1, w2, b2, compute_dtype=jnp.bfloat16)
    out = mlp_forward(x, params)
    jax.block_until_ready(out)
    assert out.shape == (batch, output_dim)

    # Reference 1: identical bf16-for-MXU / f32-accumulate semantics.
    w1_t, b1_2d, w2_t, b2_2d = params
    h_ref = jnp.dot(x.astype(jnp.bfloat16), w1_t, preferred_element_type=jnp.float32)
    h_ref = jnp.maximum(h_ref + b1_2d, 0.0).astype(jnp.bfloat16)
    ref_bf16 = jnp.dot(h_ref, w2_t, preferred_element_type=jnp.float32) + b2_2d
    assert jnp.allclose(out, ref_bf16, atol=2e-3, rtol=2e-3), "mismatch vs bf16 reference"

    # Reference 2: plain f32 math of the PyTorch module (loose tol for bf16 cast).
    ref_f32 = jnp.maximum(x @ w1.T + b1, 0.0) @ w2.T + b2
    assert jnp.allclose(out, ref_f32, atol=1e-1, rtol=5e-2), "mismatch vs f32 reference"

    print("KERNEL_OK")
</pallas_src>

<mosaic_0001>
module attributes {stable_mosaic.version = 11 : i64} {
  func.func @mlp_kernel(%arg0: i32, %arg1: memref<8x32xbf16, #tpu.memory_space<vmem>>, %arg2: memref<32x64xbf16, #tpu.memory_space<vmem>>, %arg3: memref<1x64xf32, #tpu.memory_space<vmem>>, %arg4: memref<64x16xbf16, #tpu.memory_space<vmem>>, %arg5: memref<1x16xf32, #tpu.memory_space<vmem>>, %arg6: memref<8x16xf32, #tpu.memory_space<vmem>>) attributes {dimension_semantics = [#tpu.dimension_semantics<parallel>], iteration_bounds = array<i64: 1>, scalar_prefetch = 0 : i64, scratch_operands = 0 : i64, tpu.core_type = #tpu.core_type<tc>, window_params = [{transform_indices = @transform_0, window_bounds = array<i64: 8, 32>}, {pipeline_mode = #tpu.pipeline_mode<synchronous>, transform_indices = @transform_1, window_bounds = array<i64: 32, 64>}, {pipeline_mode = #tpu.pipeline_mode<synchronous>, transform_indices = @transform_2, window_bounds = array<i64: 1, 64>}, {pipeline_mode = #tpu.pipeline_mode<synchronous>, transform_indices = @transform_3, window_bounds = array<i64: 64, 16>}, {pipeline_mode = #tpu.pipeline_mode<synchronous>, transform_indices = @transform_4, window_bounds = array<i64: 1, 16>}, {transform_indices = @transform_5, window_bounds = array<i64: 8, 16>}]} {
    %c0 = arith.constant 0 : index
    %c0_0 = arith.constant 0 : index
    %0 = vector.load %arg1[%c0, %c0_0] : memref<8x32xbf16, #tpu.memory_space<vmem>>, vector<8x32xbf16>
    %c0_1 = arith.constant 0 : index
    %c0_2 = arith.constant 0 : index
    %1 = vector.load %arg2[%c0_1, %c0_2] : memref<32x64xbf16, #tpu.memory_space<vmem>>, vector<32x64xbf16>
    %cst = arith.constant dense<0.000000e+00> : vector<8x64xf32>
    %2 = tpu.matmul %0, %1, %cst {dimension_numbers = #tpu.dot_dimension_numbers<[1], [0], [0], [1], [0, 0, 1, 1], [], []>} : vector<8x32xbf16>, vector<32x64xbf16>, vector<8x64xf32> -> vector<8x64xf32>
    %c0_3 = arith.constant 0 : index
    %c0_4 = arith.constant 0 : index
    %3 = vector.load %arg3[%c0_3, %c0_4] : memref<1x64xf32, #tpu.memory_space<vmem>>, vector<1x64xf32>
    %4 = vector.broadcast %3 : vector<1x64xf32> to vector<8x64xf32>
    %5 = arith.addf %2, %4 : vector<8x64xf32>
    %cst_5 = arith.constant 0.000000e+00 : f32
    %6 = vector.broadcast %cst_5 : f32 to vector<8x64xf32>
    %7 = arith.maximumf %5, %6 : vector<8x64xf32>
    %8 = arith.truncf %7 : vector<8x64xf32> to vector<8x64xbf16>
    %c0_6 = arith.constant 0 : index
    %c0_7 = arith.constant 0 : index
    %9 = vector.load %arg4[%c0_6, %c0_7] : memref<64x16xbf16, #tpu.memory_space<vmem>>, vector<64x16xbf16>
    %cst_8 = arith.constant dense<0.000000e+00> : vector<8x16xf32>
    %10 = tpu.matmul %8, %9, %cst_8 {dimension_numbers = #tpu.dot_dimension_numbers<[1], [0], [0], [1], [0, 0, 1, 1], [], []>} : vector<8x64xbf16>, vector<64x16xbf16>, vector<8x16xf32> -> vector<8x16xf32>
    %c0_9 = arith.constant 0 : index
    %c0_10 = arith.constant 0 : index
    %11 = vector.load %arg5[%c0_9, %c0_10] : memref<1x16xf32, #tpu.memory_space<vmem>>, vector<1x16xf32>
    %12 = vector.broadcast %11 : vector<1x16xf32> to vector<8x16xf32>
    %13 = arith.addf %10, %12 : vector<8x16xf32>
    %c0_11 = arith.constant 0 : index
    %c0_12 = arith.constant 0 : index
    %14 = vector.load %arg6[%c0_11, %c0_12] : memref<8x16xf32, #tpu.memory_space<vmem>>, vector<8x16xf32>
    tpu.vector_store %arg6[%c0_11, %c0_12], %13 {strides = array<i32>} : memref<8x16xf32, #tpu.memory_space<vmem>>, vector<8x16xf32>,
    return
  }
  func.func @transform_0(%arg0: i32) -> (i32, i32) {
    %c0_i32 = arith.constant 0 : i32
    %c0_i32_0 = arith.constant 0 : i32
    return %arg0, %c0_i32 : i32, i32
  }
  func.func @transform_1(%arg0: i32) -> (i32, i32) {
    %c0_i32 = arith.constant 0 : i32
    %c0_i32_0 = arith.constant 0 : i32
    %c0_i32_1 = arith.constant 0 : i32
    return %c0_i32, %c0_i32_0 : i32, i32
  }
  func.func @transform_2(%arg0: i32) -> (i32, i32) {
    %c0_i32 = arith.constant 0 : i32
    %c0_i32_0 = arith.constant 0 : i32
    %c0_i32_1 = arith.constant 0 : i32
    return %c0_i32, %c0_i32_0 : i32, i32
  }
  func.func @transform_3(%arg0: i32) -> (i32, i32) {
    %c0_i32 = arith.constant 0 : i32
    %c0_i32_0 = arith.constant 0 : i32
    %c0_i32_1 = arith.constant 0 : i32
    return %c0_i32, %c0_i32_0 : i32, i32
  }
  func.func @transform_4(%arg0: i32) -> (i32, i32) {
    %c0_i32 = arith.constant 0 : i32
    %c0_i32_0 = arith.constant 0 : i32
    %c0_i32_1 = arith.constant 0 : i32
    return %c0_i32, %c0_i32_0 : i32, i32
  }
  func.func @transform_5(%arg0: i32) -> (i32, i32) {
    %c0_i32 = arith.constant 0 : i32
    %c0_i32_0 = arith.constant 0 : i32
    return %arg0, %c0_i32 : i32, i32
  }
}

</mosaic_0001>

<bundles_post_ra>
// kernel: tpu_custom_call.1
= control target key start
LH: loop header
LB: loop body
LE: loop exit
PB: predicated region body
PF: predicated region fallthrough
CT: control target
= control target key end

     0   :  { %s255_s0 = inlined_call_operand.vmem [shape: bf16[8,32], index: 0, kind: input, shape index: {}]   ;;  %s256_s1 = inlined_call_operand.vmem [shape: bf16[32,64], index: 1, kind: input, shape index: {}]   ;;  %s257_s2 = inlined_call_operand.vmem [shape: f32[1,64], index: 2, kind: input, shape index: {}]   ;;  %s258_s3 = inlined_call_operand.vmem [shape: bf16[64,16], index: 3, kind: input, shape index: {}]   ;;  %s259_s4 = inlined_call_operand.vmem [shape: f32[1,16], index: 4, kind: input, shape index: {}]   ;;  %s260_s5 = inlined_call_operand.hbm [shape: f32[8,16], index: 5, kind: output, shape index: {}]  }
   0x1   :  { %v160_v0 = vld [vmem:[%s256_s1 + $0x8] sm:$0xff]  ;;  %v164_v1 = vld [vmem:[%s258_s3 + $0x18] sm:$0xff]  ;;  %v159_v2 = vld [vmem:[%s256_s1] sm:$0xff] }
   0x2   :  { %53 = vmatpush.bf16.msra.mxu0 %v160_v0 }
   0x3   :  { %10 = vsyncpa [#allocation3], 0  ;;  %106 = vmatpush.bf16.msra.mxu1 %v164_v1  ;;  %v163_v3 = vld [vmem:[%s258_s3 + $0x10] sm:$0xff]  ;;  %v22_v4 = vld [vmem:[%s255_s0] sm:$0xf]  ;;  %vm43_vm0 = vcmask 261120  }
   0x4   :  { %v162_v5 = vld [vmem:[%s258_s3 + $0x8] sm:$0xff]  ;;  %v161_v6 = vld [vmem:[%s258_s3] sm:$0xff]  ;;  %vm98_vm1 = vcmask 523264   ;;  %s194_s9 = smov [#allocation2]   ;;  %s124_s12 = sshll.u32 %s260_s5, 4  ;;  %vm115_vm2 = vcmask 130048   ;;  %s125_s12 = int_to_ptr.hbm [resolvable:$true] %s124_s12 }
   0x5   :  { %v166_v7 = vld [vmem:[%s257_s2] ss:$0 sm:$0xff]  ;;  %s122_s10 = sshll.u32 %s194_s9, 4  ;;  %s123_s10 = int_to_ptr.vmem [resolvable:$true] %s122_s10 }
   0x6   :  { %54 = vmatpush.bf16.msra.mxu0 %v159_v2  ;;  %v167_v13 = vld [vmem:[%s259_s4] ss:$0 sm:$0xff] }
   0x7   :  { %107 = vmatpush.bf16.msra.mxu1 %v163_v3 }
   0x9   :  { %141 = vmatmul.msk.bf16.vlgmr.msra.gmra.mxu0 %vm43_vm0, %v22_v4 }
   0xb   :  { %108 = vmatpush.bf16.msra.mxu1 %v162_v5 }
   0xf   :  { %109 = vmatpush.bf16.msra.mxu1 %v161_v6 }
  0x86   :  { %v56_v8 = vpop.f32.mrf.mxu0 }
  0x87   :  { %v57_v9 = vadd.f32 %v166_v7, %v56_v8 }
  0x89   :  { %v60_v10 = vmax.f32 %v57_v9, 0.0 }
  0x8b   :  { %v61_v11 = vpack.c.bf16 %v60_v10, %v60_v10 }
  0x8d   :  { %158 = vmatmul.msk.bf16.vlgmr.msra.gmra.mxu1 %vm98_vm1, %v61_v11 }
  0x8e   :  { %v58_v12 = vpop.f32.mrf.mxu0 }
 0x10a   :  { %v111_v14 = vpop.f32.mrf.mxu1 }
 0x10b   :  { %v112_v15 = vadd.f32 %v167_v13, %v111_v14 }
 0x10d   :  { %116 = vst.msk [vmem:[#allocation2] sm:$0xff] %vm115_vm2, %v112_v15 }
 0x10e   :  { %127 = dma.vmem_to_hbm [thread:$0]  %s123_s10, 128, %s125_s12, [#allocation3]  }
 0x112   :  { %v113_v16 = vpop.f32.mrf.mxu1 }
 0x113   :  { %192 = dma.done.wait [#allocation3], 128  }
 0x114   :  { %193 = vsyncadd [#allocation3], 4294967168 }
 0x115   :  { %132 = vsyncpa [#allocation3], 1 }

</bundles_post_ra>
